<compile_context>
chip_gen: v5e
topology: v5e:2x2
jax: 0.10.0
libtpu: 0.0.40
codegen_flags: <defaults>
</compile_context>

<pallas_src>
import functools
import math

import jax
import jax.numpy as jnp
from jax.experimental import pallas as pl
from jax.experimental.pallas import tpu as pltpu


def _layernorm_kernel(ab_ref, x_ref, o_ref, *, eps: float, d_model: int):
    """ab_ref: (2,) f32 in SMEM = [alpha, bias]; x_ref/o_ref: (TR, D) tiles."""
    x = x_ref[...].astype(jnp.float32)                       # (TR, D)
    mean = jnp.mean(x, axis=-1, keepdims=True)               # (TR, 1)
    diff = x - mean
    # PyTorch x.std(dim=-1) uses Bessel's correction (divide by D-1).
    var = jnp.sum(diff * diff, axis=-1, keepdims=True) * (1.0 / float(d_model - 1))
    std = jnp.sqrt(var)
    alpha = ab_ref[0]
    bias = ab_ref[1]
    y = alpha * diff / (std + jnp.float32(eps)) + bias
    o_ref[...] = y.astype(o_ref.dtype)


def layer_normalization(x: jnp.ndarray,
                        alpha: jnp.ndarray,
                        bias: jnp.ndarray,
                        *,
                        eps: float = 1e-6,
                        block_rows: int = 256) -> jnp.ndarray:
    """LayerNormalization over the last dim of x (B, S, D), scalar alpha/bias."""
    B, S, D = x.shape
    R = B * S
    xr = x.reshape(R, D)

    # Row tile: multiple of 8 (sublane), capped by total rows, sized for VMEM.
    TR = min(int(block_rows), R)
    TR = max(8, ((TR + 7) // 8) * 8)
    R_pad = ((R + TR - 1) // TR) * TR
    if R_pad != R:
        xr = jnp.pad(xr, ((0, R_pad - R), (0, 0)))

    ab = jnp.stack([jnp.asarray(alpha, jnp.float32).reshape(()),
                    jnp.asarray(bias, jnp.float32).reshape(())])   # (2,) f32

    kernel = functools.partial(_layernorm_kernel, eps=float(eps), d_model=D)

    out = pl.pallas_call(
        kernel,
        out_shape=jax.ShapeDtypeStruct((R_pad, D), x.dtype),
        grid=(R_pad // TR,),
        in_specs=[
            pl.BlockSpec(memory_space=pltpu.MemorySpace.SMEM),     # [alpha, bias]
            pl.BlockSpec((TR, D), lambda i: (i, 0)),               # x row tile
        ],
        out_specs=pl.BlockSpec((TR, D), lambda i: (i, 0)),
        compiler_params=pltpu.CompilerParams(
            # Rows are independent -> shard grid across cores (v7x megacore).
            dimension_semantics=("parallel",),
        ),
    )(ab, xr)

    return out[:R].reshape(B, S, D)


def decoder_forward(x, encoder_output, src_mask, target_mask, alpha, bias,
                    *, eps: float = 1e-6):
    """Mirror of Decoder.forward.

    # TODO(synk): the nn.ModuleList decoder layers have no definition in the
    # provided spec, so the layer loop is a pass-through; only the final
    # LayerNormalization runs as a Pallas kernel.
    """
    del encoder_output, src_mask, target_mask  # consumed only by the opaque layers
    return layer_normalization(x, alpha, bias, eps=eps)


if __name__ == "__main__":
    # Small shapes consistent with the module: batch=2, seq=8, d_model=32.
    B, S, D = 2, 8, 32
    eps = 1e-6

    key = jax.random.PRNGKey(0)
    kx, ke = jax.random.split(key)
    x = jax.random.normal(kx, (B, S, D), dtype=jnp.float32)
    encoder_output = jax.random.normal(ke, (B, S, D), dtype=jnp.float32)
    src_mask = jnp.ones((B, 1, S, S), dtype=jnp.float32)
    target_mask = jnp.tril(jnp.ones((S, S), dtype=jnp.float32))[None, None]

    # Parameters as initialized in the PyTorch module: torch.ones(1).
    alpha = jnp.ones((1,), dtype=jnp.float32)
    bias = jnp.ones((1,), dtype=jnp.float32)

    out = decoder_forward(x, encoder_output, src_mask, target_mask, alpha, bias, eps=eps)
    out = jax.block_until_ready(out)

    # Pure-JAX reference (unbiased std, matching torch.Tensor.std default).
    mean = jnp.mean(x, axis=-1, keepdims=True)
    std = jnp.sqrt(jnp.sum((x - mean) ** 2, axis=-1, keepdims=True) / (D - 1))
    ref = alpha[0] * (x - mean) / (std + eps) + bias[0]

    assert out.shape == (B, S, D)
    assert jnp.allclose(out, ref, atol=1e-5, rtol=1e-5), "mismatch vs reference"

    print("KERNEL_OK")
</pallas_src>

<mosaic_0001>
module attributes {stable_mosaic.version = 11 : i64} {
  func.func @_layernorm_kernel(%arg0: i32, %arg1: memref<2xf32, #tpu.memory_space<smem>>, %arg2: memref<16x32xf32, #tpu.memory_space<vmem>>, %arg3: memref<16x32xf32, #tpu.memory_space<vmem>>) attributes {dimension_semantics = [#tpu.dimension_semantics<parallel>], iteration_bounds = array<i64: 1>, scalar_prefetch = 0 : i64, scratch_operands = 0 : i64, tpu.core_type = #tpu.core_type<tc>, window_params = [{transform_indices = @transform_0, window_bounds = array<i64: 2>}, {transform_indices = @transform_1, window_bounds = array<i64: 16, 32>}, {transform_indices = @transform_2, window_bounds = array<i64: 16, 32>}]} {
    %c0 = arith.constant 0 : index
    %c0_0 = arith.constant 0 : index
    %0 = vector.load %arg2[%c0, %c0_0] : memref<16x32xf32, #tpu.memory_space<vmem>>, vector<16x32xf32>
    %cst = arith.constant dense<0.000000e+00> : vector<16xf32>
    %1 = vector.multi_reduction <add>, %0, %cst [1] : vector<16x32xf32> to vector<16xf32>
    %2 = vector.shape_cast %1 : vector<16xf32> to vector<16x1xf32>
    %cst_1 = arith.constant 3.200000e+01 : f32
    %3 = vector.broadcast %cst_1 : f32 to vector<16x1xf32>
    %4 = arith.divf %2, %3 : vector<16x1xf32>
    %5 = vector.broadcast %4 : vector<16x1xf32> to vector<16x32xf32>
    %6 = arith.subf %0, %5 : vector<16x32xf32>
    %7 = arith.mulf %6, %6 : vector<16x32xf32>
    %cst_2 = arith.constant dense<0.000000e+00> : vector<16xf32>
    %8 = vector.multi_reduction <add>, %7, %cst_2 [1] : vector<16x32xf32> to vector<16xf32>
    %9 = vector.shape_cast %8 : vector<16xf32> to vector<16x1xf32>
    %cst_3 = arith.constant 0.0322580636 : f32
    %10 = vector.broadcast %cst_3 : f32 to vector<16x1xf32>
    %11 = arith.mulf %9, %10 : vector<16x1xf32>
    %12 = math.sqrt %11 : vector<16x1xf32>
    %c0_4 = arith.constant 0 : index
    %13 = memref.load %arg1[%c0_4] : memref<2xf32, #tpu.memory_space<smem>>
    %c1 = arith.constant 1 : index
    %14 = memref.load %arg1[%c1] : memref<2xf32, #tpu.memory_space<smem>>
    %15 = vector.broadcast %13 : f32 to vector<16x32xf32>
    %16 = arith.mulf %15, %6 : vector<16x32xf32>
    %cst_5 = arith.constant 9.99999997E-7 : f32
    %17 = vector.broadcast %cst_5 : f32 to vector<16x1xf32>
    %18 = arith.addf %12, %17 : vector<16x1xf32>
    %19 = vector.broadcast %18 : vector<16x1xf32> to vector<16x32xf32>
    %20 = arith.divf %16, %19 : vector<16x32xf32>
    %21 = vector.broadcast %14 : f32 to vector<16x32xf32>
    %22 = arith.addf %20, %21 : vector<16x32xf32>
    %c0_6 = arith.constant 0 : index
    %c0_7 = arith.constant 0 : index
    %23 = vector.load %arg3[%c0_6, %c0_7] : memref<16x32xf32, #tpu.memory_space<vmem>>, vector<16x32xf32>
    tpu.vector_store %arg3[%c0_6, %c0_7], %22 {strides = array<i32>} : memref<16x32xf32, #tpu.memory_space<vmem>>, vector<16x32xf32>,
    return
  }
  func.func @transform_0(%arg0: i32) -> i32 {
    %c0_i32 = arith.constant 0 : i32
    %c0_i32_0 = arith.constant 0 : i32
    return %c0_i32 : i32
  }
  func.func @transform_1(%arg0: i32) -> (i32, i32) {
    %c0_i32 = arith.constant 0 : i32
    %c0_i32_0 = arith.constant 0 : i32
    return %arg0, %c0_i32 : i32, i32
  }
  func.func @transform_2(%arg0: i32) -> (i32, i32) {
    %c0_i32 = arith.constant 0 : i32
    %c0_i32_0 = arith.constant 0 : i32
    return %arg0, %c0_i32 : i32, i32
  }
}

</mosaic_0001>

<bundles_post_ra>
// kernel: tpu_custom_call.1
= control target key start
LH: loop header
LB: loop body
LE: loop exit
PB: predicated region body
PF: predicated region fallthrough
CT: control target
= control target key end

     0   :  { %7 = vsyncpa [#allocation5], 0  ;;  %s293_s0 = inlined_call_operand.hbm [shape: f32[2], index: 0, kind: input, shape index: {}]   ;;  %s294_s1 = inlined_call_operand.hbm [shape: f32[16,32], index: 1, kind: input, shape index: {}]   ;;  %s295_s2 = inlined_call_operand.hbm [shape: f32[16,32], index: 2, kind: output, shape index: {}]  }
   0x1   :  { %8 = vsyncpa [#allocation3], 0 }
   0x2   :  { %9 = vsyncpa [#allocation4], 0  ;;  %s15_s11 = sshll.u32 %s293_s0, 4  ;;  %s23_s14 = sshll.u32 %s294_s1, 4  ;;  %s16_s11 = int_to_ptr.hbm [resolvable:$true] %s15_s11  ;;  %s24_s14 = int_to_ptr.hbm [resolvable:$true] %s23_s14 }
   0x3   :  { %s240_s15 = smov [#allocation2]   ;;  %s241_s16 = smov [#allocation6]  }
   0x4   :  { %18 = dma.hbm_to_smem %s16_s11, 16, %s240_s15, [#allocation5]  }
   0x5   :  { %s25_s17 = sshll.u32 %s241_s16, 4  ;;  %s242_s18 = smov 128   ;;  %s26_s17 = int_to_ptr.vmem [resolvable:$true] %s25_s17 }
   0x6   :  { %s243_s19 = smov 8  }
   0x7   :  { %31 = dma.hbm_to_vmem [thread:$0]  %s24_s14, 256, %s26_s17, [#allocation3], %s242_s18, %s242_s18, %s243_s19  }
   0x8   :  { %234 = dma.done.wait [#allocation5], 16  }
   0x9   :  { %235 = vsyncadd [#allocation5], 4294967280 }
   0xa   :  { %236 = dma.done.wait [#allocation3], 256  }
   0xb   :  { %237 = vsyncadd [#allocation3], 4294967040 }
   0xc   :  { %40 = sfence }
   0xd   :  { %v41_v0 = vld [vmem:[#allocation6] sm:$0xff]  ;;  %vm43_vm0 = vcmask 261120   ;;  %v42_v2 = vld [vmem:[#allocation6 + $0x8] sm:$0xff]  ;;  %v244_v4 = vmov 32.0   ;;  %s278_s0 = sld [smem:[#allocation2]]  ;;  %s245_s20 = smov [#allocation7]  }
   0xe   :  { %v44_v1 = vsel %vm43_vm0, %v41_v0, 0.0  ;;  %v47_v3 = vsel %vm43_vm0, %v42_v2, 0.0  ;;  %164 = vrcp.f32 %v244_v4  ;;  %s280_s1 = sld [smem:[#allocation2 + $0x1]]  ;;  %s141_s21 = sshll.u32 %s245_s20, 4  ;;  %s142_s21 = int_to_ptr.vmem [resolvable:$true] %s141_s21 }
   0xf   :  { %45 = vadd.xlane.f32.xlu0 %v44_v1  ;;  %s143_s24 = sshll.u32 %s295_s2, 4  ;;  %s144_s24 = int_to_ptr.hbm [resolvable:$true] %s143_s24 }
  0x13   :  { %v97_v53 = vstv %s278_s0 }
  0x14   :  { %v165_v5 = vpop.eup %164  ;;  %v132_v61 = vstv %s280_s1 }
  0x15   :  { %v51_v6 = vmul.f32 32.0, %v165_v5  ;;  %vm55_vm1 = vweird.f32 %v165_v5 }
  0x17   :  { %48 = vadd.xlane.f32.xlu0 %v47_v3  ;;  %v52_v7 = vsub.f32 1.0, %v51_v6 }
  0x19   :  { %v53_v8 = vmul.f32 %v165_v5, %v52_v7 }
  0x1b   :  { %v54_v9 = vadd.f32 %v165_v5, %v53_v8 }
  0x1d   :  { %v56_v10 = vsel %vm55_vm1, %v165_v5, %v54_v9 }
  0x82   :  { %v46_v11 = vpop.xlane.xlu0 %45 }
  0x83   :  { %v57_v12 = vmul.f32 %v56_v10, %v46_v11 }
  0x85   :  { %v59_v13 = vsub.f32 %v41_v0, %v57_v12 }
  0x87   :  { %v61_v14 = vmul.f32 %v59_v13, %v59_v13  ;;  %v98_v57 = vmul.f32 %v97_v53, %v59_v13 }
  0x89   :  { %v63_v15 = vsel %vm43_vm0, %v61_v14, 0.0 }
  0x8a   :  { %64 = vadd.xlane.f32.xlu1 %v63_v15  ;;  %v49_v16 = vpop.xlane.xlu0 %48 }
  0x8b   :  { %v58_v17 = vmul.f32 %v56_v10, %v49_v16 }
  0x8d   :  { %v273_v18 = vsub.f32 %v42_v2, %v58_v17 }
  0x8f   :  { %v62_v19 = vmul.f32 %v273_v18, %v273_v18  ;;  %v99_v6 = vmul.f32 %v97_v53, %v273_v18 }
  0x91   :  { %v66_v20 = vsel %vm43_vm0, %v62_v19, 0.0 }
  0x92   :  { %67 = vadd.xlane.f32.xlu1 %v66_v20 }
  0xfd   :  { %v65_v21 = vpop.xlane.xlu1 %64 }
  0xfe   :  { %v69_v22 = vmul.f32 0.032258064, %v65_v21 }
 0x100   :  { %166 = vrsqrt.f32 %v69_v22  ;;  %vm78_vm2 = vcmp.eq.f32.partialorder %v69_v22, inf  ;;  %v81_v35 = vand.u32 2147483648, %v69_v22  ;;  %vm80_vm3 = vcmp.eq.f32.partialorder %v69_v22, 0.0 }
 0x105   :  { %v68_v23 = vpop.xlane.xlu1 %67 }
 0x106   :  { %v167_v24 = vpop.eup %166  ;;  %v70_v25 = vmul.f32 0.032258064, %v68_v23 }
 0x107   :  { %v72_v26 = vmul.f32 %v167_v24, %v69_v22 }
 0x108   :  { %168 = vrsqrt.f32 %v70_v25  ;;  %vm90_vm4 = vcmp.eq.f32.partialorder %v70_v25, inf  ;;  %v93_v43 = vand.u32 2147483648, %v70_v25  ;;  %vm92_vm5 = vcmp.eq.f32.partialorder %v70_v25, 0.0 }
 0x109   :  { %v73_v27 = vmul.f32 %v167_v24, %v72_v26 }
 0x10b   :  { %v74_v28 = vmul.f32 0.5, %v73_v27 }
 0x10d   :  { %v75_v29 = vsub.f32 1.5, %v74_v28 }
 0x10e   :  { %v169_v30 = vpop.eup %168 }
 0x10f   :  { %v76_v31 = vmul.f32 %v167_v24, %v75_v29  ;;  %v84_v32 = vmul.f32 %v169_v30, %v70_v25 }
 0x111   :  { %v77_v33 = vmul.f32 %v76_v31, %v69_v22  ;;  %v85_v34 = vmul.f32 %v169_v30, %v84_v32 }
 0x113   :  { %v79_v36 = vsel %vm78_vm2, %v69_v22, %v77_v33  ;;  %v86_v37 = vmul.f32 0.5, %v85_v34 }
 0x114   :  { %v82_v38 = vsel %vm80_vm3, %v81_v35, %v79_v36 }
 0x115   :  { %v87_v39 = vsub.f32 1.5, %v86_v37  ;;  %v100_v40 = vadd.f32 1e-06, %v82_v38 }
 0x117   :  { %v88_v41 = vmul.f32 %v169_v30, %v87_v39  ;;  %170 = vrcp.f32 %v100_v40  ;;  %v113_v50 = vand.u32 2147483648, %v100_v40  ;;  %v111_v52 = vand.u32 2147483647, %v100_v40 }
 0x118   :  { %vm107_vm7 = vweird.f32 %v100_v40 }
 0x119   :  { %v89_v42 = vmul.f32 %v88_v41, %v70_v25  ;;  %v114_v56 = vor.u32 1.1754944e-38, %v113_v50  ;;  %vm112_vm9 = vcmp.eq.f32.partialorder %v111_v52, 8.507059e+37 }
 0x11b   :  { %v91_v44 = vsel %vm90_vm4, %v70_v25, %v89_v42 }
 0x11c   :  { %v94_v45 = vsel %vm92_vm5, %v93_v43, %v91_v44 }
 0x11d   :  { %v171_v46 = vpop.eup %170  ;;  %v101_v47 = vadd.f32 1e-06, %v94_v45 }
 0x11e   :  { %v103_v48 = vmul.f32 %v171_v46, %v100_v40  ;;  %vm108_vm6 = vweird.f32 %v171_v46 }
 0x11f   :  { %172 = vrcp.f32 %v101_v47  ;;  %vm109_vm8 = vmor %vm107_vm7, %vm108_vm6  ;;  %v128_v0 = vand.u32 2147483648, %v101_v47  ;;  %v126_v2 = vand.u32 2147483647, %v101_v47  ;;  %vm122_vm11 = vweird.f32 %v101_v47 }
 0x120   :  { %v104_v49 = vsub.f32 1.0, %v103_v48 }
 0x121   :  { %v129_v5 = vor.u32 1.1754944e-38, %v128_v0  ;;  %vm127_vm13 = vcmp.eq.f32.partialorder %v126_v2, 8.507059e+37 }
 0x122   :  { %v105_v51 = vmul.f32 %v171_v46, %v104_v49 }
 0x124   :  { %v106_v54 = vadd.f32 %v171_v46, %v105_v51 }
 0x125   :  { %v173_v55 = vpop.eup %172 }
 0x126   :  { %v110_v58 = vsel %vm109_vm8, %v171_v46, %v106_v54  ;;  %v118_v59 = vmul.f32 %v173_v55, %v101_v47  ;;  %vm123_vm10 = vweird.f32 %v173_v55 }
 0x127   :  { %v115_v60 = vsel %vm112_vm9, %v114_v56, %v110_v58  ;;  %vm124_vm12 = vmor %vm122_vm11, %vm123_vm10 }
 0x128   :  { %v116_v62 = vmul.f32 %v115_v60, %v98_v57  ;;  %v119_v63 = vsub.f32 1.0, %v118_v59 }
 0x12a   :  { %v120_v1 = vmul.f32 %v173_v55, %v119_v63  ;;  %v133_v3 = vadd.f32 %v132_v61, %v116_v62 }
 0x12c   :  { %v121_v4 = vadd.f32 %v173_v55, %v120_v1  ;;  %135 = vst.msk [vmem:[#allocation7] sm:$0xff] %vm43_vm0, %v133_v3 }
 0x12e   :  { %v125_v7 = vsel %vm124_vm12, %v173_v55, %v121_v4 }
 0x12f   :  { %v130_v8 = vsel %vm127_vm13, %v129_v5, %v125_v7 }
 0x130   :  { %v131_v9 = vmul.f32 %v130_v8, %v99_v6 }
 0x132   :  { %v134_v10 = vadd.f32 %v132_v61, %v131_v9 }
 0x134   :  { %136 = vst.msk [vmem:[#allocation7 + $0x8] sm:$0xff] %vm43_vm0, %v134_v10 }
 0x135   :  { %149 = dma.vmem_to_hbm [thread:$0]  %s142_s21, 256, %s144_s24, [#allocation4], %s242_s18, %s242_s18, %s243_s19  }
 0x136   :  { %238 = dma.done.wait [#allocation4], 256  }
 0x137   :  { %239 = vsyncadd [#allocation4], 4294967040 }
 0x138   :  { %154 = vsyncpa [#allocation3], 1 }
 0x139   :  { %155 = vsyncpa [#allocation4], 1 }
 0x13a   :  { %156 = vsyncpa [#allocation5], 1 }

</bundles_post_ra>
